<compile_context>
chip_gen: v7x
topology: tpu7x:2x2x1
jax: 0.10.0
libtpu: 0.0.40
codegen_flags: <defaults>
</compile_context>

<pallas_src>
import jax
import jax.numpy as jnp
from jax.experimental import pallas as pl
from jax.experimental.pallas import tpu as pltpu

ALPHA = 0.2            # GCN2Conv alpha
LEAKY_SLOPE = 0.01     # nn.LeakyReLU default


def _leaky_relu(x):
    return jnp.where(x > 0, x, LEAKY_SLOPE * x)


# --------------------------------------------------------------------------------------
# Kernel 1: input MLP  x = LeakyReLU(feature @ W_in + b_in), row-tiled.
# --------------------------------------------------------------------------------------
def input_mlp_kernel(feat_ref, w_ref, b_ref, o_ref):
    acc = jnp.dot(feat_ref[...].astype(jnp.bfloat16), w_ref[...],
                  preferred_element_type=jnp.float32)
    o_ref[...] = _leaky_relu(acc + b_ref[...]).astype(o_ref.dtype)


def input_mlp(feature, w_in_bf16, b_in_f32, *, tm):
    n, emb = feature.shape
    hid = w_in_bf16.shape[1]
    return pl.pallas_call(
        input_mlp_kernel,
        out_shape=jax.ShapeDtypeStruct((n, hid), jnp.bfloat16),
        grid_spec=pltpu.PrefetchScalarGridSpec(
            num_scalar_prefetch=0,
            grid=(n // tm,),
            in_specs=[
                pl.BlockSpec((tm, emb), lambda i: (i, 0)),
                pl.BlockSpec((emb, hid), lambda i: (0, 0)),
                pl.BlockSpec((1, hid), lambda i: (0, 0)),
            ],
            out_specs=pl.BlockSpec((tm, hid), lambda i: (i, 0)),
        ),
        compiler_params=pltpu.CompilerParams(
            dimension_semantics=("parallel",)),
    )(feature, w_in_bf16, b_in_f32)


# --------------------------------------------------------------------------------------
# Kernel 2: one GCN2Conv propagation (optionally fused with the output Linear):
#   out = ((1-a) * A_hat @ h + a * x) @ W + b
# Grid = (row tiles, node-contraction tiles); contraction axis last, f32 accumulator.
# --------------------------------------------------------------------------------------
def gcn2_prop_kernel(a_ref, h_ref, x_ref, w_ref, b_ref, o_ref, acc_ref):
    k = pl.program_id(1)

    @pl.when(k == 0)
    def _():
        acc_ref[...] = jnp.zeros_like(acc_ref)

    # (TM, TK) bf16 @ (TK, HID) bf16 -> f32 accumulate
    acc_ref[...] += jnp.dot(a_ref[...], h_ref[...],
                            preferred_element_type=jnp.float32)

    @pl.when(k == pl.num_programs(1) - 1)
    def _():
        prop = (1.0 - ALPHA) * acc_ref[...] + ALPHA * x_ref[...].astype(jnp.float32)
        out = jnp.dot(prop.astype(jnp.bfloat16), w_ref[...],
                      preferred_element_type=jnp.float32) + b_ref[...]
        o_ref[...] = out.astype(o_ref.dtype)


def _vmem_limit_bytes(tm, tk, hid, out_w):
    # Double-buffered inputs + output + f32 scratch accumulator, with headroom.
    bf2, f4 = 2, 4
    need = (2 * tm * tk * bf2          # A tile
            + 2 * tk * hid * bf2       # propagated h tile
            + 2 * tm * hid * bf2       # residual x tile
            + 2 * hid * out_w * bf2    # weight
            + 2 * out_w * f4           # bias
            + 2 * tm * out_w * f4      # output tile (f32 worst case)
            + tm * hid * f4)           # accumulator scratch
    # Never go below the default scoped limit; stay within v7x physical VMEM (64 MiB).
    return int(min(max(4 * need, 32 * 1024 * 1024), 60 * 1024 * 1024))


def gcn2_prop(a_hat_bf16, h_bf16, x_bf16, w_bf16, b_f32, *, tm, tk, out_dtype):
    n = a_hat_bf16.shape[0]
    hid = h_bf16.shape[1]
    out_w = w_bf16.shape[1]
    n_row, n_col = n // tm, n // tk

    flops = 2 * n * n * hid + 2 * n * hid * out_w
    bytes_accessed = (n * n * 2                    # A_hat (bf16)
                      + n_row * n * hid * 2        # h re-streamed per row tile
                      + n * hid * 2                # x residual
                      + hid * out_w * 2            # weight
                      + n * out_w * jnp.dtype(out_dtype).itemsize)

    return pl.pallas_call(
        gcn2_prop_kernel,
        out_shape=jax.ShapeDtypeStruct((n, out_w), out_dtype),
        grid_spec=pltpu.PrefetchScalarGridSpec(
            num_scalar_prefetch=0,
            grid=(n_row, n_col),
            in_specs=[
                pl.BlockSpec((tm, tk), lambda i, k: (i, k)),       # A_hat tile
                pl.BlockSpec((tk, hid), lambda i, k: (k, 0)),      # propagated features
                pl.BlockSpec((tm, hid), lambda i, k: (i, 0)),      # initial residual x
                pl.BlockSpec((hid, out_w), lambda i, k: (0, 0)),   # weight (resident)
                pl.BlockSpec((1, out_w), lambda i, k: (0, 0)),     # bias (resident)
            ],
            out_specs=pl.BlockSpec((tm, out_w), lambda i, k: (i, 0)),
            scratch_shapes=[pltpu.VMEM((tm, hid), jnp.float32)],
        ),
        compiler_params=pltpu.CompilerParams(
            dimension_semantics=("parallel", "arbitrary"),
            vmem_limit_bytes=_vmem_limit_bytes(tm, tk, hid, out_w)),
        cost_estimate=pl.CostEstimate(flops=flops, transcendentals=0,
                                      bytes_accessed=bytes_accessed),
    )(a_hat_bf16, h_bf16, x_bf16, w_bf16, b_f32)


# --------------------------------------------------------------------------------------
# Glue
# --------------------------------------------------------------------------------------
def build_normalized_adjacency(edge_index, num_nodes):
    """gcn_norm with add_self_loops=False, flow='source_to_target', densified (f32)."""
    row, col = edge_index[0], edge_index[1]          # row = source j, col = target i
    ones = jnp.ones(row.shape, jnp.float32)
    deg = jnp.zeros((num_nodes,), jnp.float32).at[col].add(ones)
    dinv = jnp.where(deg > 0, jax.lax.rsqrt(deg), 0.0)
    norm = dinv[row] * dinv[col]
    # A_hat[i, j] accumulates norm over edges (j -> i)
    return jnp.zeros((num_nodes, num_nodes), jnp.float32).at[col, row].add(norm)


def gcn2_forward(feature, edge_index, edge_type, params, *, tm=None, tk=None):
    del edge_type  # unused by the reference forward
    n = feature.shape[0]
    hid = params["w_in"].shape[1]
    out_dim = params["w_out"].shape[1]

    tm = tm if tm is not None else min(256, n)
    tk = tk if tk is not None else min(256, n)
    assert n % tm == 0 and n % tk == 0, "node count must divide into tiles"

    # Dense normalized adjacency, stored bf16 for MXU / HBM / VMEM efficiency.
    a_hat = build_normalized_adjacency(edge_index, n).astype(jnp.bfloat16)

    # Fold W_g2 @ W_out (no nonlinearity between them) and pad output lanes to 128.
    out_pad = max(128, ((out_dim + 127) // 128) * 128)
    w_comb = params["w_g2"] @ params["w_out"]                              # [hid, out_dim]
    w_comb_p = jnp.zeros((hid, out_pad), jnp.float32).at[:, :out_dim].set(w_comb)
    b_out_p = jnp.zeros((1, out_pad), jnp.float32).at[:, :out_dim].set(params["b_out"])

    w_in_b = params["w_in"].astype(jnp.bfloat16)
    w_g1_b = params["w_g1"].astype(jnp.bfloat16)
    w_comb_b = w_comb_p.astype(jnp.bfloat16)
    zero_bias = jnp.zeros((1, hid), jnp.float32)

    # x = LeakyReLU(feature @ W_in + b_in), cached in bf16
    x = input_mlp(feature, w_in_b, params["b_in"], tm=tm)                  # [n, hid] bf16

    # TODO(synk): training-mode dropout (pltpu.prng_random_bits) not emitted; eval semantics.
    # h1 = ((1-a) A x + a x) @ W_g1
    h1 = gcn2_prop(a_hat, x, x, w_g1_b, zero_bias, tm=tm, tk=tk,
                   out_dtype=jnp.bfloat16)                                 # [n, hid] bf16

    # out = ((1-a) A h1 + a x) @ (W_g2 @ W_out) + b_out   (padded lanes, then sliced)
    out_p = gcn2_prop(a_hat, h1, x, w_comb_b, b_out_p, tm=tm, tk=tk,
                      out_dtype=jnp.float32)                               # [n, out_pad]
    return out_p[:, :out_dim]


def init_params(key, embedding_dimension=16, hidden_dimension=128, out_dim=3):
    ks = jax.random.split(key, 6)

    def glorot(k, shape):
        fan_in, fan_out = shape
        lim = (6.0 / (fan_in + fan_out)) ** 0.5
        return jax.random.uniform(k, shape, jnp.float32, -lim, lim)

    def linear_init(k, shape):
        lim = 1.0 / (shape[0] ** 0.5)
        return jax.random.uniform(k, shape, jnp.float32, -lim, lim)

    return {
        "w_in":  linear_init(ks[0], (embedding_dimension, hidden_dimension)),
        "b_in":  linear_init(ks[1], (1, hidden_dimension)),
        "w_g1":  glorot(ks[2], (hidden_dimension, hidden_dimension)),
        "w_g2":  glorot(ks[3], (hidden_dimension, hidden_dimension)),
        "w_out": linear_init(ks[4], (hidden_dimension, out_dim)),
        "b_out": linear_init(ks[5], (1, out_dim)),
    }


def reference_forward(feature, edge_index, params):
    """Pure f32 XLA reference of the PyTorch module (eval mode)."""
    a_hat = build_normalized_adjacency(edge_index, feature.shape[0])
    x = _leaky_relu(feature @ params["w_in"] + params["b_in"])
    h = ((1.0 - ALPHA) * (a_hat @ x) + ALPHA * x) @ params["w_g1"]
    h = ((1.0 - ALPHA) * (a_hat @ h) + ALPHA * x) @ params["w_g2"]
    return h @ params["w_out"] + params["b_out"]


if __name__ == "__main__":
    N, E = 512, 4096
    EMB, HID, OUT = 16, 128, 3

    key = jax.random.PRNGKey(0)
    k_feat, k_src, k_dst, k_par = jax.random.split(key, 4)

    feature = jax.random.normal(k_feat, (N, EMB), jnp.float32)
    edge_index = jnp.stack([
        jax.random.randint(k_src, (E,), 0, N),
        jax.random.randint(k_dst, (E,), 0, N),
    ]).astype(jnp.int32)
    edge_type = jnp.zeros((E,), jnp.int32)   # unused by the reference forward

    params = init_params(k_par, EMB, HID, OUT)

    out = gcn2_forward(feature, edge_index, edge_type, params)
    out = jax.block_until_ready(out)

    ref = reference_forward(feature, edge_index, params)
    assert out.shape == (N, OUT)
    # bf16 MXU operands with f32 accumulation: loosened tolerance vs pure-f32 reference.
    max_err = float(jnp.max(jnp.abs(out - ref)))
    assert jnp.allclose(out, ref, atol=5e-2, rtol=5e-2), f"max abs err = {max_err}"

    print("KERNEL_OK")
</pallas_src>

<mosaic_0001>
module attributes {stable_mosaic.version = 11 : i64} {
  func.func @input_mlp_kernel(%arg0: i32, %arg1: memref<256x16xf32, #tpu.memory_space<vmem>>, %arg2: memref<16x128xbf16, #tpu.memory_space<vmem>>, %arg3: memref<1x128xf32, #tpu.memory_space<vmem>>, %arg4: memref<256x128xbf16, #tpu.memory_space<vmem>>) attributes {dimension_semantics = [#tpu.dimension_semantics<parallel>], iteration_bounds = array<i64: 2>, scalar_prefetch = 0 : i64, scratch_operands = 0 : i64, tpu.core_type = #tpu.core_type<tc>, window_params = [{transform_indices = @transform_0, window_bounds = array<i64: 256, 16>}, {pipeline_mode = #tpu.pipeline_mode<synchronous>, transform_indices = @transform_1, window_bounds = array<i64: 16, 128>}, {pipeline_mode = #tpu.pipeline_mode<synchronous>, transform_indices = @transform_2, window_bounds = array<i64: 1, 128>}, {transform_indices = @transform_3, window_bounds = array<i64: 256, 128>}]} {
    %c0 = arith.constant 0 : index
    %c0_0 = arith.constant 0 : index
    %0 = vector.load %arg1[%c0, %c0_0] : memref<256x16xf32, #tpu.memory_space<vmem>>, vector<256x16xf32>
    %1 = arith.truncf %0 : vector<256x16xf32> to vector<256x16xbf16>
    %c0_1 = arith.constant 0 : index
    %c0_2 = arith.constant 0 : index
    %2 = vector.load %arg2[%c0_1, %c0_2] : memref<16x128xbf16, #tpu.memory_space<vmem>>, vector<16x128xbf16>
    %cst = arith.constant dense<0.000000e+00> : vector<256x128xf32>
    %3 = tpu.matmul %1, %2, %cst {dimension_numbers = #tpu.dot_dimension_numbers<[1], [0], [0], [1], [0, 0, 1, 1], [], []>} : vector<256x16xbf16>, vector<16x128xbf16>, vector<256x128xf32> -> vector<256x128xf32>
    %c0_3 = arith.constant 0 : index
    %c0_4 = arith.constant 0 : index
    %4 = vector.load %arg3[%c0_3, %c0_4] : memref<1x128xf32, #tpu.memory_space<vmem>>, vector<1x128xf32>
    %5 = vector.broadcast %4 : vector<1x128xf32> to vector<256x128xf32>
    %6 = arith.addf %3, %5 : vector<256x128xf32>
    %cst_5 = arith.constant 0.000000e+00 : f32
    %7 = vector.broadcast %cst_5 : f32 to vector<256x128xf32>
    %8 = arith.cmpf ogt, %6, %7 : vector<256x128xf32>
    %cst_6 = arith.constant 0.00999999977 : f32
    %9 = vector.broadcast %cst_6 : f32 to vector<256x128xf32>
    %10 = arith.mulf %9, %6 : vector<256x128xf32>
    %11 = arith.select %8, %6, %10 : vector<256x128xi1>, vector<256x128xf32>
    %12 = arith.truncf %11 : vector<256x128xf32> to vector<256x128xbf16>
    %c0_7 = arith.constant 0 : index
    %c0_8 = arith.constant 0 : index
    %13 = vector.load %arg4[%c0_7, %c0_8] : memref<256x128xbf16, #tpu.memory_space<vmem>>, vector<256x128xbf16>
    tpu.vector_store %arg4[%c0_7, %c0_8], %12 {strides = array<i32>} : memref<256x128xbf16, #tpu.memory_space<vmem>>, vector<256x128xbf16>,
    return
  }
  func.func @transform_0(%arg0: i32) -> (i32, i32) {
    %c0_i32 = arith.constant 0 : i32
    %c0_i32_0 = arith.constant 0 : i32
    return %arg0, %c0_i32 : i32, i32
  }
  func.func @transform_1(%arg0: i32) -> (i32, i32) {
    %c0_i32 = arith.constant 0 : i32
    %c0_i32_0 = arith.constant 0 : i32
    %c0_i32_1 = arith.constant 0 : i32
    return %c0_i32, %c0_i32_0 : i32, i32
  }
  func.func @transform_2(%arg0: i32) -> (i32, i32) {
    %c0_i32 = arith.constant 0 : i32
    %c0_i32_0 = arith.constant 0 : i32
    %c0_i32_1 = arith.constant 0 : i32
    return %c0_i32, %c0_i32_0 : i32, i32
  }
  func.func @transform_3(%arg0: i32) -> (i32, i32) {
    %c0_i32 = arith.constant 0 : i32
    %c0_i32_0 = arith.constant 0 : i32
    return %arg0, %c0_i32 : i32, i32
  }
}

</mosaic_0001>

<bundles_post_ra>
// kernel: tpu_custom_call.1
= control target key start
LH: loop header
LB: loop body
LE: loop exit
PB: predicated region body
PF: predicated region fallthrough
CT: control target
= control target key end

     0   :  { %8 = vsyncpa [#allocation3], 0  ;;  %s1370_s0 = inlined_call_operand.vmem [shape: f32[512,16], index: 0, kind: input, shape index: {}]   ;;  %s1371_s1 = inlined_call_operand.vmem [shape: bf16[16,128], index: 1, kind: input, shape index: {}]   ;;  %s1372_s2 = inlined_call_operand.vmem [shape: f32[1,128], index: 2, kind: input, shape index: {}]   ;;  %s1373_s3 = inlined_call_operand.hbm [shape: bf16[512,128], index: 3, kind: output, shape index: {}]  }
   0x1   :  { %10 = vsyncpa [#allocation3 + $0x1], 0  ;;  %s1150_s12 = smov 0   ;;  %s1152_s13 = smov 0  }
   0x2   :  { %s1154_s14 = smov 0   ;;  %s1156_s15 = smov 0  }
   0x3 LB: > { %s1171_s16 = sadd.s32 4294967295, %s1125_s15   ;;  %s778_s17 = sadd.s32 4294967294, %s1125_s15   ;;  %s1125_s15 = sphi %s1156_s15, %s1379_s15   ;;  %s1121_s14 = sphi %s1154_s14, %s1378_s14   ;;  %s1117_s13 = sphi %s1152_s13, %s1377_s13   ;;  %s1113_s12 = sphi %s1150_s12, %s1376_s12  }
   0x4   : > { %s1175_s18 = sadd.s32 1, %s1125_s15   ;;  %s91_s19 = sadd.s32 1, %s1121_s14 }
   0x5   : > { %s88_s20 = ssub.s32 %s1125_s15, %s1175_s18  ;;  %p101_p0 = scmp.ne.s32.totalorder %s1121_s14, %s1117_s13 }
   0x6   : > { %p89_p1 = scmp.eq.s32.totalorder %s88_s20, 0  ;;  %p102_p2 = scmp.eq.s32.totalorder %s1171_s16, 1 }
   0x7   : > { %p107_p3 = scmp.ne.s32.totalorder %s1117_s13, %s1113_s12  ;;  %p108_p4 = scmp.eq.s32.totalorder %s778_s17, 1 }
   0x8   : > { %s1186_s21 = scalar_select %p89_p1, %s1121_s14, %s91_s19  }
   0x9   : > { %p1188_p5 = por %p102_p2, %p101_p0  ;;  %p1192_p6 = por %p108_p4, %p107_p3 }
   0xa   : > { %p781_p7 = scmp.ge.s32.totalorder %s1125_s15, 1  ;;  %p141_p8 = scmp.lt.s32.totalorder %s1125_s15, 3 }
   0xc   : > { %p142_p9 = pnand %p781_p7, %p141_p8 }
   0xd   : > { %v1062_v0 = vld [vmem:[%s1371_s1] sm:$0xff] (!%p142_p9)   ;;  %s783_s26 = sshll.u32 (!%p142_p9), %s1171_s16, 5  ;;  %vm236_vm0 = vcmask (!%p142_p9), 130048   ;;  %s162_s6 = sand.u32 (!%p142_p9), 1, %s1117_s13  }
   0xe   : > { %145 = sbr.rel (%p142_p9) target bundleno = 295 (0x127), region = 32  ;;  %p166_p10 = scmp.lt.s32.totalorder (!%p142_p9), %s783_s26, 63  ;;  %985 = vmatprep.subr.bf16.mxu0 (!%p142_p9), %v1062_v0  ;;  %1019 = vmatprep.subr.bf16.mxu1 (!%p142_p9), %v1062_v0  ;;  %v1258_v49 = vld [vmem:[%s1372_s2] ss:$0 sm:$0xff] (!%p142_p9) }
   0xf   : > { %986 = vmatpush3.bf16.msra.mxu0 (!%p142_p9), %v1062_v0  ;;  %1020 = vmatpush3.bf16.msra.mxu1 (!%p142_p9), %v1062_v0  ;;  %s782_s7 = sshll.u32 (!%p142_p9), %s162_s6, 7  ;;  %s872_s9 = sshll.u32 (!%p142_p9), %s1171_s16, 11 }
  0x10   : > { %s1273_s8 = scalar_lea.vmem (!%p142_p9), [#allocation2], %s782_s7  ;;  %s1319_s17 = scalar_lea.hbm (!%p142_p9), %s1373_s3, %s872_s9 }
  0x11   : > { %s716_s10 = sshll.u32 (!%p142_p9), %s1273_s8, 4  ;;  %s1329_s19 = scalar_lea.sflag (!%p142_p9), [#allocation3], %s162_s6  ;;  %s1321_s10 = int_to_ptr.vmem [resolvable:$true] %s716_s10 }
  0x12   : > { %s1063_s20 = scalar_lea.vmem (!%p142_p9), %s1321_s10, 2048  ;;  %s1127_s24 = smov (!%p142_p9), [#allocation2]  }
  0x13   : > { %p1064_p11 = scmp.ne.s32.totalorder (!%p142_p9), %s1321_s10, %s1063_s20  ;;  %s1067_s25 = sshll.u32 (!%p142_p9), %s1127_s24, 4  ;;  %s1068_s25 = int_to_ptr.vmem [resolvable:$false] %s1067_s25 }
  0x14   : > { %p1070_p0 = scmp.lt.s32.totalorder (!%p142_p9), %s1321_s10, %s1068_s25 }
  0x15   : > { %s1381_s26 = smov (!%p166_p10, %s783_s26), 63  ;;  %p1065_p12 = pnand %p1064_p11, %p1188_p5 }
  0x16   : > { %s784_s27 = sshll.u32 %s1381_s26, 3  ;;  %s1069_s26 = scalar_lea.vmem %s1068_s25, 4096 }
  0x17   : > { %s1205_s30 = scalar_lea.vmem %s1370_s0, %s784_s27  ;;  %p1066_p13 = pneg %p1065_p12 }
  0x18   : > { %v173_v1 = vld [vmem:[%s1205_s30] sm:$0xff]  ;;  %v174_v2 = vld [vmem:[%s1205_s30 + $0x8] sm:$0xff]  ;;  %v175_v6 = vld [vmem:[%s1205_s30 + $0x10] sm:$0xff]  ;;  %p1071_p1 = scmp.lt.s32.totalorder %s1069_s26, %s1063_s20 }
  0x19   : > { %v189_v3 = vld [vmem:[%s1205_s30 + $0x80] sm:$0xff]  ;;  %v205_v4 = vpack.c.bf16 %v174_v2, %v173_v1  ;;  %v190_v5 = vld [vmem:[%s1205_s30 + $0x88] sm:$0xff]  ;;  %v176_v7 = vld [vmem:[%s1205_s30 + $0x18] sm:$0xff] }
  0x1a   : > { %v213_v8 = vpack.c.bf16 %v190_v5, %v189_v3  ;;  %v206_v9 = vpack.c.bf16 %v176_v7, %v175_v6  ;;  %v191_v10 = vld [vmem:[%s1205_s30 + $0x90] sm:$0xff]  ;;  %v192_v11 = vld [vmem:[%s1205_s30 + $0x98] sm:$0xff]  ;;  %v177_v12 = vld [vmem:[%s1205_s30 + $0x20] sm:$0xff]  ;;  %p1072_p2 = por %p1071_p1, %p1070_p0 }
  0x1b   : > { %987 = vmatprep.mubr.msk.bf16.mxu0 %vm236_vm0, %v205_v4  ;;  %v214_v13 = vpack.c.bf16 %v192_v11, %v191_v10  ;;  %v178_v14 = vld [vmem:[%s1205_s30 + $0x28] sm:$0xff]  ;;  %v193_v15 = vld [vmem:[%s1205_s30 + $0xa0] sm:$0xff]  ;;  %v179_v19 = vld [vmem:[%s1205_s30 + $0x30] sm:$0xff] }
  0x1c   : > { %v194_v16 = vld [vmem:[%s1205_s30 + $0xa8] sm:$0xff]  ;;  %1003 = vmatprep.mubr.msk.bf16.mxu1 %vm236_vm0, %v213_v8  ;;  %988 = vmatmul.mubr.msk.bf16.vlgmr.msra.gmra.mrb[0].mxu0 %vm236_vm0, %v206_v9  ;;  %v207_v17 = vpack.c.bf16 %v178_v14, %v177_v12  ;;  %v180_v20 = vld [vmem:[%s1205_s30 + $0x38] sm:$0xff]  ;;  %v195_v21 = vld [vmem:[%s1205_s30 + $0xb0] sm:$0xff]  ;;  %p1073_p3 = pnand %p1072_p2, %p1066_p13 }
  0x1d   : > { %v215_v18 = vpack.c.bf16 %v194_v16, %v193_v15  ;;  %1004 = vmatmul.mubr.msk.bf16.vlgmr.msra.gmra.mrb[0].mxu1 %vm236_vm0, %v214_v13  ;;  %v196_v22 = vld [vmem:[%s1205_s30 + $0xb8] sm:$0xff]  ;;  %v181_v23 = vld [vmem:[%s1205_s30 + $0x40] sm:$0xff]  ;;  %v182_v24 = vld [vmem:[%s1205_s30 + $0x48] sm:$0xff]  ;;  %v208_v27 = vpack.c.bf16 %v180_v20, %v179_v19 }
  0x1e   : > { %991 = vmatprep.mubr.msk.bf16.mxu0 %vm236_vm0, %v207_v17  ;;  %v197_v25 = vld [vmem:[%s1205_s30 + $0xc0] sm:$0xff]  ;;  %v198_v26 = vld [vmem:[%s1205_s30 + $0xc8] sm:$0xff]  ;;  %v216_v28 = vpack.c.bf16 %v196_v22, %v195_v21  ;;  %v209_v29 = vpack.c.bf16 %v182_v24, %v181_v23  ;;  %v183_v31 = vld [vmem:[%s1205_s30 + $0x50] sm:$0xff] }
  0x1f   : > { %1007 = vmatprep.mubr.msk.bf16.mxu1 %vm236_vm0, %v215_v18  ;;  %v217_v30 = vpack.c.bf16 %v198_v26, %v197_v25  ;;  %v184_v32 = vld [vmem:[%s1205_s30 + $0x58] sm:$0xff]  ;;  %v199_v33 = vld [vmem:[%s1205_s30 + $0xd0] sm:$0xff]  ;;  %v185_v35 = vld [vmem:[%s1205_s30 + $0x60] sm:$0xff] }
  0x20   : > { %v200_v34 = vld [vmem:[%s1205_s30 + $0xd8] sm:$0xff]  ;;  %v186_v36 = vld [vmem:[%s1205_s30 + $0x68] sm:$0xff]  ;;  %v201_v37 = vld [vmem:[%s1205_s30 + $0xe0] sm:$0xff]  ;;  %v210_v39 = vpack.c.bf16 %v184_v32, %v183_v31 }
  0x21   : > { %v202_v38 = vld [vmem:[%s1205_s30 + $0xe8] sm:$0xff]  ;;  %v218_v40 = vpack.c.bf16 %v200_v34, %v199_v33  ;;  %v211_v41 = vpack.c.bf16 %v186_v36, %v185_v35  ;;  %v187_v43 = vld [vmem:[%s1205_s30 + $0x70] sm:$0xff]  ;;  %v188_v44 = vld [vmem:[%s1205_s30 + $0x78] sm:$0xff] }
  0x22   : > { %v219_v42 = vpack.c.bf16 %v202_v38, %v201_v37  ;;  %v203_v45 = vld [vmem:[%s1205_s30 + $0xf0] sm:$0xff]  ;;  %v204_v46 = vld [vmem:[%s1205_s30 + $0xf8] sm:$0xff]  ;;  %v212_v47 = vpack.c.bf16 %v188_v44, %v187_v43 }
  0x23   : > { %v220_v48 = vpack.c.bf16 %v204_v46, %v203_v45 }
  0x24   : > { %992 = vmatmul.mubr.msk.bf16.gmra.mrb[4].mxu0 %vm236_vm0, %v208_v27 }
  0x25   : > { %1008 = vmatmul.mubr.msk.bf16.gmra.mrb[4].mxu1 %vm236_vm0, %v216_v28  ;;  %995 = vmatprep.mubr.msk.bf16.mxu0 %vm236_vm0, %v209_v29 }
  0x26   : > { %1011 = vmatprep.mubr.msk.bf16.mxu1 %vm236_vm0, %v217_v30 }
  0x2c   : > { %996 = vmatmul.mubr.msk.bf16.gmra.mrb[8].mxu0 %vm236_vm0, %v210_v39 }
  0x2d   : > { %1012 = vmatmul.mubr.msk.bf16.gmra.mrb[8].mxu1 %vm236_vm0, %v218_v40  ;;  %999 = vmatprep.mubr.msk.bf16.mxu0 %vm236_vm0, %v211_v41 }
  0x2e   : > { %1015 = vmatprep.mubr.msk.bf16.mxu1 %vm236_vm0, %v219_v42 }
  0x34   : > { %1000 = vmatmul.mubr.msk.bf16.gmra.mrb[12].mxu0 %vm236_vm0, %v212_v47 }
  0x35   : > { %1016 = vmatmul.mubr.msk.bf16.gmra.mrb[12].mxu1 %vm236_vm0, %v220_v48 }
  0xef   : > { %v989_v50 = vpop.f32.mrb[0].mxu0 }
  0xf0   : > { %v328_v51 = vadd.f32 %v989_v50, %v1258_v49  ;;  %v1005_v52 = vpop.f32.mrb[0].mxu1  ;;  %v319_v53 = vpop.f32.mrb[1].mxu0 }
  0xf1   : > { %v392_v54 = vadd.f32 %v1005_v52, %v1258_v49  ;;  %v320_v55 = vadd.f32 %v1258_v49, %v319_v53  ;;  %v383_v56 = vpop.f32.mrb[1].mxu1  ;;  %v990_v57 = vpop.f32.mrb[2].mxu0 }
  0xf2   : > { %vm448_vm1 = vcmp.gt.f32.partialorder %v328_v51, 0.0  ;;  %v480_v58 = vmul.f32 0.01, %v328_v51  ;;  %v384_v59 = vadd.f32 %v1258_v49, %v383_v56  ;;  %v331_v60 = vadd.f32 %v990_v57, %v1258_v49  ;;  %v1006_v61 = vpop.f32.mrb[2].mxu1  ;;  %v322_v62 = vpop.f32.mrb[3].mxu0 }
  0xf3   : > { %vm464_vm2 = vcmp.gt.f32.partialorder %v392_v54, 0.0  ;;  %v496_v63 = vmul.f32 0.01, %v392_v54  ;;  %vm446_vm3 = vcmp.gt.f32.partialorder %v320_v55, 0.0  ;;  %v478_v0 = vmul.f32 0.01, %v320_v55 }
  0xf4   : > { %vm462_vm4 = vcmp.gt.f32.partialorder %v384_v59, 0.0  ;;  %v494_v1 = vmul.f32 0.01, %v384_v59  ;;  %vm449_vm5 = vcmp.gt.f32.partialorder %v331_v60, 0.0  ;;  %v386_v2 = vpop.f32.mrb[3].mxu1  ;;  %v512_v3 = vsel %vm448_vm1, %v328_v51, %v480_v58 }
  0xf5   : > { %v481_v4 = vmul.f32 0.01, %v331_v60  ;;  %v395_v5 = vadd.f32 %v1006_v61, %v1258_v49  ;;  %v528_v6 = vsel %vm464_vm2, %v392_v54, %v496_v63  ;;  %v510_v7 = vsel %vm446_vm3, %v320_v55, %v478_v0 }
  0xf6   : > { %v323_v8 = vadd.f32 %v1258_v49, %v322_v62  ;;  %v387_v9 = vadd.f32 %v1258_v49, %v386_v2  ;;  %v526_v10 = vsel %vm462_vm4, %v384_v59, %v494_v1 }
  0xf7   : > { %v513_v11 = vsel %vm449_vm5, %v331_v60, %v481_v4  ;;  %vm465_vm6 = vcmp.gt.f32.partialorder %v395_v5, 0.0  ;;  %v497_v12 = vmul.f32 0.01, %v395_v5  ;;  %v993_v13 = vpop.f32.mrb[4].mxu0 }
  0xf8   : > { %v881_v14 = vpack.c.bf16 %v513_v11, %v512_v3  ;;  %vm447_vm7 = vcmp.gt.f32.partialorder %v323_v8, 0.0  ;;  %v479_v15 = vmul.f32 0.01, %v323_v8  ;;  %vm463_vm8 = vcmp.gt.f32.partialorder %v387_v9, 0.0  ;;  %v1009_v16 = vpop.f32.mrb[4].mxu1  ;;  %v335_v17 = vpop.f32.mrb[5].mxu0 }
  0xf9   : > { %v529_v18 = vsel %vm465_vm6, %v395_v5, %v497_v12  ;;  %v495_v19 = vmul.f32 0.01, %v387_v9  ;;  %v344_v20 = vadd.f32 %v993_v13, %v1258_v49  ;;  %v408_v21 = vadd.f32 %v1009_v16, %v1258_v49  ;;  %v399_v22 = vpop.f32.mrb[5].mxu1  ;;  %v994_v23 = vpop.f32.mrb[6].mxu0 }
  0xfa   : > { %953 = vst [vmem:[%s1273_s8 + $0x8] sm:$0xff] %v881_v14   ;;  %v921_v24 = vpack.c.bf16 %v529_v18, %v528_v6  ;;  %v511_v25 = vsel %vm447_vm7, %v323_v8, %v479_v15  ;;  %v336_v26 = vadd.f32 %v1258_v49, %v335_v17  ;;  %v400_v27 = vadd.f32 %v1258_v49, %v399_v22  ;;  %v1010_v28 = vpop.f32.mrb[6].mxu1  ;;  %v338_v29 = vpop.f32.mrb[7].mxu0 }
  0xfb   : > { %v876_v30 = vpack.c.bf16 %v511_v25, %v510_v7  ;;  %v527_v31 = vsel %vm463_vm8, %v387_v9, %v495_v19  ;;  %vm452_vm9 = vcmp.gt.f32.partialorder %v344_v20, 0.0  ;;  %v484_v32 = vmul.f32 0.01, %v344_v20  ;;  %v402_v33 = vpop.f32.mrb[7].mxu1 }
  0xfc   : > { %961 = vst [vmem:[%s1273_s8 + $0x48] sm:$0xff] %v921_v24   ;;  %v916_v34 = vpack.c.bf16 %v527_v31, %v526_v10  ;;  %vm468_vm10 = vcmp.gt.f32.partialorder %v408_v21, 0.0  ;;  %v500_v35 = vmul.f32 0.01, %v408_v21  ;;  %vm450_vm11 = vcmp.gt.f32.partialorder %v336_v26, 0.0 }
  0xfd   : > { %877 = vst [vmem:[%s1273_s8] sm:$0xff] %v876_v30   ;;  %v516_v36 = vsel %vm452_vm9, %v344_v20, %v484_v32  ;;  %v482_v37 = vmul.f32 0.01, %v336_v26  ;;  %v498_v38 = vmul.f32 0.01, %v400_v27  ;;  %v347_v39 = vadd.f32 %v994_v23, %v1258_v49 }
  0xfe   : > { %960 = vst [vmem:[%s1273_s8 + $0x40] sm:$0xff] %v916_v34   ;;  %v411_v40 = vadd.f32 %v1010_v28, %v1258_v49  ;;  %v339_v41 = vadd.f32 %v1258_v49, %v338_v29  ;;  %v532_v42 = vsel %vm468_vm10, %v408_v21, %v500_v35  ;;  %vm466_vm12 = vcmp.gt.f32.partialorder %v400_v27, 0.0 }
  0xff   : > { %v514_v43 = vsel %vm450_vm11, %v336_v26, %v482_v37  ;;  %v403_v44 = vadd.f32 %v1258_v49, %v402_v33  ;;  %v997_v45 = vpop.f32.mrb[8].mxu0  ;;  %vm453_vm13 = vcmp.gt.f32.partialorder %v347_v39, 0.0  ;;  %v485_v46 = vmul.f32 0.01, %v347_v39 }
 0x100   : > { %vm469_vm14 = vcmp.gt.f32.partialorder %v411_v40, 0.0  ;;  %v501_v47 = vmul.f32 0.01, %v411_v40  ;;  %vm451_vm15 = vcmp.gt.f32.partialorder %v339_v41, 0.0  ;;  %v483_v48 = vmul.f32 0.01, %v339_v41 }
 0x101   : > { %vm467_vm0 = vcmp.gt.f32.partialorder %v403_v44, 0.0  ;;  %v499_v50 = vmul.f32 0.01, %v403_v44  ;;  %v530_v51 = vsel %vm466_vm12, %v400_v27, %v498_v38  ;;  %v517_v52 = vsel %vm453_vm13, %v347_v39, %v485_v46  ;;  %v1013_v55 = vpop.f32.mrb[8].mxu1  ;;  %v351_v56 = vpop.f32.mrb[9].mxu0 }
 0x102   : > { %v533_v53 = vsel %vm469_vm14, %v411_v40, %v501_v47  ;;  %v360_v54 = vadd.f32 %v997_v45, %v1258_v49  ;;  %v891_v57 = vpack.c.bf16 %v517_v52, %v516_v36  ;;  %v515_v59 = vsel %vm451_vm15, %v339_v41, %v483_v48  ;;  %v415_v61 = vpop.f32.mrb[9].mxu1  ;;  %v998_v62 = vpop.f32.mrb[10].mxu0 }
 0x103   : > { %v931_v58 = vpack.c.bf16 %v533_v53, %v532_v42  ;;  %v531_v60 = vsel %vm467_vm0, %v403_v44, %v499_v50  ;;  %v886_v63 = vpack.c.bf16 %v515_v59, %v514_v43  ;;  %v1014_v2 = vpop.f32.mrb[10].mxu1  ;;  %v354_v3 = vpop.f32.mrb[11].mxu0  ;;  %v424_v4 = vadd.f32 %v1013_v55, %v1258_v49 }
 0x104   : > { %v926_v0 = vpack.c.bf16 %v531_v60, %v530_v51  ;;  %vm456_vm1 = vcmp.gt.f32.partialorder %v360_v54, 0.0  ;;  %v488_v1 = vmul.f32 0.01, %v360_v54  ;;  %955 = vst [vmem:[%s1273_s8 + $0x18] sm:$0xff] %v891_v57   ;;  %v352_v5 = vadd.f32 %v1258_v49, %v351_v56  ;;  %v418_v8 = vpop.f32.mrb[11].mxu1 }
 0x105   : > { %963 = vst [vmem:[%s1273_s8 + $0x58] sm:$0xff] %v931_v58   ;;  %v416_v6 = vadd.f32 %v1258_v49, %v415_v61  ;;  %v363_v7 = vadd.f32 %v998_v62, %v1258_v49  ;;  %954 = vst [vmem:[%s1273_s8 + $0x10] sm:$0xff] %v886_v63   ;;  %v427_v10 = vadd.f32 %v1014_v2, %v1258_v49  ;;  %vm472_vm2 = vcmp.gt.f32.partialorder %v424_v4, 0.0 }
 0x106   : > { %962 = vst [vmem:[%s1273_s8 + $0x50] sm:$0xff] %v926_v0   ;;  %v520_v9 = vsel %vm456_vm1, %v360_v54, %v488_v1  ;;  %v355_v11 = vadd.f32 %v1258_v49, %v354_v3  ;;  %v419_v12 = vadd.f32 %v1258_v49, %v418_v8  ;;  %v504_v13 = vmul.f32 0.01, %v424_v4 }
 0x107   : > { %vm454_vm3 = vcmp.gt.f32.partialorder %v352_v5, 0.0  ;;  %v486_v14 = vmul.f32 0.01, %v352_v5  ;;  %vm470_vm4 = vcmp.gt.f32.partialorder %v416_v6, 0.0  ;;  %v502_v15 = vmul.f32 0.01, %v416_v6 }
 0x108   : > { %vm457_vm5 = vcmp.gt.f32.partialorder %v363_v7, 0.0  ;;  %v489_v16 = vmul.f32 0.01, %v363_v7  ;;  %v536_v17 = vsel %vm472_vm2, %v424_v4, %v504_v13  ;;  %vm473_vm6 = vcmp.gt.f32.partialorder %v427_v10, 0.0  ;;  %v1001_v20 = vpop.f32.mrb[12].mxu0  ;;  %v1017_v21 = vpop.f32.mrb[12].mxu1 }
 0x109   : > { %v518_v18 = vsel %vm454_vm3, %v352_v5, %v486_v14  ;;  %v505_v19 = vmul.f32 0.01, %v427_v10  ;;  %v534_v22 = vsel %vm470_vm4, %v416_v6, %v502_v15  ;;  %vm455_vm7 = vcmp.gt.f32.partialorder %v355_v11, 0.0  ;;  %v367_v25 = vpop.f32.mrb[13].mxu0  ;;  %v431_v26 = vpop.f32.mrb[13].mxu1 }
 0x10a   : > { %v521_v23 = vsel %vm457_vm5, %v363_v7, %v489_v16  ;;  %v487_v24 = vmul.f32 0.01, %v355_v11  ;;  %vm471_vm8 = vcmp.gt.f32.partialorder %v419_v12, 0.0  ;;  %v503_v29 = vmul.f32 0.01, %v419_v12  ;;  %v1002_v30 = vpop.f32.mrb[14].mxu0 }
 0x10b   : > { %v901_v27 = vpack.c.bf16 %v521_v23, %v520_v9  ;;  %v537_v28 = vsel %vm473_vm6, %v427_v10, %v505_v19  ;;  %v1018_v31 = vpop.f32.mrb[14].mxu1  ;;  %v376_v34 = vadd.f32 %v1001_v20, %v1258_v49  ;;  %v440_v35 = vadd.f32 %v1017_v21, %v1258_v49  ;;  %v370_v36 = vpop.f32.mrb[15].mxu0 }
 0x10c   : > { %v941_v32 = vpack.c.bf16 %v537_v28, %v536_v17  ;;  %v519_v33 = vsel %vm455_vm7, %v355_v11, %v487_v24  ;;  %v434_v37 = vpop.f32.mrb[15].mxu1  ;;  %v535_v39 = vsel %vm471_vm8, %v419_v12, %v503_v29  ;;  %v368_v40 = vadd.f32 %v1258_v49, %v367_v25 }
 0x10d   : > { %957 = vst [vmem:[%s1273_s8 + $0x28] sm:$0xff] %v901_v27   ;;  %v896_v38 = vpack.c.bf16 %v519_v33, %v518_v18  ;;  %v432_v41 = vadd.f32 %v1258_v49, %v431_v26  ;;  %v936_v42 = vpack.c.bf16 %v535_v39, %v534_v22  ;;  %vm460_vm9 = vcmp.gt.f32.partialorder %v376_v34, 0.0 }
 0x10e   : > { %965 = vst [vmem:[%s1273_s8 + $0x68] sm:$0xff] %v941_v32   ;;  %v492_v43 = vmul.f32 0.01, %v376_v34  ;;  %vm476_vm10 = vcmp.gt.f32.partialorder %v440_v35, 0.0  ;;  %v508_v44 = vmul.f32 0.01, %v440_v35  ;;  %v379_v45 = vadd.f32 %v1002_v30, %v1258_v49 }
 0x10f   : > { %956 = vst [vmem:[%s1273_s8 + $0x20] sm:$0xff] %v896_v38   ;;  %964 = vst [vmem:[%s1273_s8 + $0x60] sm:$0xff] %v936_v42   ;;  %vm458_vm11 = vcmp.gt.f32.partialorder %v368_v40, 0.0  ;;  %v443_v46 = vadd.f32 %v1018_v31, %v1258_v49  ;;  %v490_v47 = vmul.f32 0.01, %v368_v40  ;;  %vm474_vm12 = vcmp.gt.f32.partialorder %v432_v41, 0.0 }
 0x110   : > { %v371_v48 = vadd.f32 %v1258_v49, %v370_v36  ;;  %v435_v50 = vadd.f32 %v1258_v49, %v434_v37  ;;  %v506_v51 = vmul.f32 0.01, %v432_v41  ;;  %vm461_vm13 = vcmp.gt.f32.partialorder %v379_v45, 0.0 }
 0x111   : > { %v493_v52 = vmul.f32 0.01, %v379_v45  ;;  %vm477_vm14 = vcmp.gt.f32.partialorder %v443_v46, 0.0  ;;  %v509_v53 = vmul.f32 0.01, %v443_v46  ;;  %v524_v55 = vsel %vm460_vm9, %v376_v34, %v492_v43 }
 0x112   : > { %vm459_vm15 = vcmp.gt.f32.partialorder %v371_v48, 0.0  ;;  %v491_v54 = vmul.f32 0.01, %v371_v48  ;;  %vm475_vm0 = vcmp.gt.f32.partialorder %v435_v50, 0.0  ;;  %v540_v56 = vsel %vm476_vm10, %v440_v35, %v508_v44 }
 0x113   : > { %v525_v57 = vsel %vm461_vm13, %v379_v45, %v493_v52  ;;  %v507_v49 = vmul.f32 0.01, %v435_v50  ;;  %v522_v58 = vsel %vm458_vm11, %v368_v40, %v490_v47  ;;  %v541_v60 = vsel %vm477_vm14, %v443_v46, %v509_v53 }
 0x114   : > { %v911_v59 = vpack.c.bf16 %v525_v57, %v524_v55  ;;  %v523_v61 = vsel %vm459_vm15, %v371_v48, %v491_v54  ;;  %v538_v62 = vsel %vm474_vm12, %v432_v41, %v506_v51  ;;  %v951_v63 = vpack.c.bf16 %v541_v60, %v540_v56 }
 0x115   : > { %v906_v0 = vpack.c.bf16 %v523_v61, %v522_v58  ;;  %v539_v1 = vsel %vm475_vm0, %v435_v50, %v507_v49 }
 0x116   : > { %959 = vst [vmem:[%s1273_s8 + $0x38] sm:$0xff] %v911_v59   ;;  %v946_v2 = vpack.c.bf16 %v539_v1, %v538_v62  ;;  %967 = vst [vmem:[%s1273_s8 + $0x78] sm:$0xff] %v951_v63  }
 0x117   : > { %958 = vst [vmem:[%s1273_s8 + $0x30] sm:$0xff] %v906_v0  }
 0x118   : > { %966 = vst [vmem:[%s1273_s8 + $0x70] sm:$0xff] %v946_v2  }
 0x119   : > { %1076 = shalt.err (!%p1073_p3)
}
 0x11a   : > { %s1077_s27 = scalar_lea.hbm %s1319_s17, 2048  ;;  %s1081_s30 = scalar_lea.hbm %s1373_s3, 4096 }
 0x11b   : > { %p1078_p4 = scmp.ne.s32.totalorder %s1319_s17, %s1077_s27  ;;  %p1082_p9 = scmp.lt.u32.totalorder %s1319_s17, %s1373_s3 }
 0x11c   : > { %p1083_p10 = scmp.lt.u32.totalorder %s1081_s30, %s1077_s27  ;;  %p1085_p12 = scmp.lt.u32.totalorder %s1077_s27, %s1319_s17 }
 0x11d   : > { %p1079_p7 = pnand %p1078_p4, %p1188_p5 }
 0x11e   : > { %p1084_p11 = por %p1083_p10, %p1082_p9 }
 0x11f   : > { %p1080_p8 = pneg %p1079_p7 }
 0x120   : > { %p1086_p13 = por %p1085_p12, %p1084_p11 }
 0x122   : > { %p1087_p0 = pnand %p1086_p13, %p1080_p8 }
 0x124   : > { %1090 = shalt.err (!%p1087_p0)
}
 0x125   : > { %s1128_s6 = smov 64   ;;  %s1129_s7 = smov 4  }
 0x126   : > { %1021 = dma.vmem_to_hbm [thread:$0]  (%p1188_p5), %s1321_s10, 2048, %s1319_s17, %s1329_s19, %s1128_s6, %s1128_s6, %s1129_s7  }
 0x127 PF: > { %p1027_p1 = scmp.ge.s32.totalorder %s1125_s15, 2  ;;  %s731_s8 = sand.u32 1, %s1113_s12  }
 0x128   : > { %s732_s9 = scalar_lea.sflag [#allocation3], %s731_s8 }
 0x129   : > { %p1024_p2 = pnand %p1027_p1, %p1192_p6 }
 0x12b   : > { %1108 = dma.done.wait (!%p1024_p2), %s732_s9, 2048  }
 0x12c   : > { %1110 = vsyncadd (!%p1024_p2), %s732_s9, 4294965248  ;;  %p13_p3 = scmp.ge.s32.totalorder %s1175_s18, 4   ;;  %s1376_s12 = smov %s1117_s13 }
 0x12d   : > { %s1377_s13 = smov %s1121_s14  ;;  %s1378_s14 = smov %s1186_s21 }
 0x12e   : > { %s1379_s15 = smov %s1175_s18  ;;  %15 = sbr.rel (!%p13_p3) target bundleno = 3 (0x3), region = 67 }
 0x135   :  { %737 = vsyncpa [#allocation3], 1 }
 0x136   :  { %739 = vsyncpa [#allocation3 + $0x1], 1 }

</bundles_post_ra>
